<compile_context>
chip_gen: v5e
topology: v5e:2x2
jax: 0.10.0
libtpu: 0.0.40
codegen_flags: <defaults>
</compile_context>

<pallas_src>
import jax
import jax.numpy as jnp
import numpy as np
from jax.experimental import pallas as pl
from jax.experimental.pallas import tpu as pltpu

C_OUT, KH, KW, H, W = 4, 3, 3, 16, 16
HW = H * W  # 256

# Flattened-lane tap shifts for the 3x3 SAME conv: tap (dh, dw) reads x[k + dh*W + dw].
SHIFTS = tuple(dh * W + dw for dh in (-1, 0, 1) for dw in (-1, 0, 1))


def _build_tap_masks() -> np.ndarray:
    """(9, 256) f32 validity masks (SAME zero padding at image borders), built at import."""
    k = np.arange(HW)
    r, c = k // W, k % W
    masks = np.zeros((KH * KW, HW), dtype=np.float32)
    t = 0
    for dh in (-1, 0, 1):
        for dw in (-1, 0, 1):
            masks[t] = ((r + dh >= 0) & (r + dh < H) &
                        (c + dw >= 0) & (c + dw < W)).astype(np.float32)
            t += 1
    return masks


TAP_MASKS = _build_tap_masks()


def conv_fuse_kernel(x_ref, w_ref, b_ref, m_ref, out_ref):
    # x_ref:   (1, 256) f32 VMEM -- row-major flattened 16x16 input plane
    # w_ref:   (4, 9)   f32 VMEM -- conv weights, channel-major / tap-minor (OIHW flattened)
    # b_ref:   (4, 1)   f32 VMEM -- conv bias
    # m_ref:   (9, 256) f32 VMEM -- constant tap-validity masks (SAME zero padding)
    # out_ref: (4, 256) f32 VMEM -- lane-dense output (channel on sublanes, row-major flatten)
    x = x_ref[...]                                          # (1, 256)
    w = w_ref[...]                                          # (4, 9)
    masks = m_ref[...]                                      # (9, 256)

    # TODO(synk): self.conv1 is undefined in the original module; Conv2d(1, 4, 3, padding=1) chosen.
    conv = jnp.broadcast_to(b_ref[...], (C_OUT, HW))        # start from bias, (4, 256)
    for t, s in enumerate(SHIFTS):
        if s == 0:
            tap = x                                         # center tap: mask is all-ones
        else:
            # tap[k] = x[k + s] where in-bounds, else 0 (the SAME-padding ring).
            tap = pltpu.roll(x, shift=(-s) % HW, axis=1) * masks[t:t + 1, :]
        conv = conv + w[:, t:t + 1] * tap                   # (4,1) x (1,256) broadcast FMA

    # v5 = x1.view(-1,256).view(16,16) is the input plane itself (row-major).
    # TODO(synk): original writes view(4, 4), invalid for 256 elements; view(16, 16) assumed.
    # v7 = v5 + conv ; v9 = relu(v7) ; v11 = conv + v9 ; v13 = relu(v11)
    # TODO(synk): original v10 + v9 broadcast is shape-invalid; v9 is viewed back to conv's shape.
    inner = jnp.maximum(x + conv, 0.0)                      # (4, 256)
    out_ref[...] = jnp.maximum(conv + inner, 0.0)           # single full-width lane-dense store


@jax.jit
def model_forward(x1, weight, bias):
    """x1: (1,1,16,16) f32, weight: (4,1,3,3) f32, bias: (4,) f32 -> (4, 256) f32."""
    x_flat = x1.astype(jnp.float32).reshape(1, HW)              # free row-major bitcast
    w_flat = weight.astype(jnp.float32).reshape(C_OUT, KH * KW)  # free row-major bitcast
    b_col = bias.astype(jnp.float32).reshape(C_OUT, 1)
    return pl.pallas_call(
        conv_fuse_kernel,
        out_shape=jax.ShapeDtypeStruct((C_OUT, HW), jnp.float32),
        in_specs=[pl.BlockSpec(memory_space=pltpu.MemorySpace.VMEM)] * 4,
        out_specs=pl.BlockSpec(memory_space=pltpu.MemorySpace.VMEM),
    )(x_flat, w_flat, b_col, jnp.asarray(TAP_MASKS))


def reference_forward(x1, weight, bias):
    conv = jax.lax.conv_general_dilated(
        x1, weight, window_strides=(1, 1), padding="SAME",
        dimension_numbers=("NCHW", "OIHW", "NCHW"))[0] + bias[:, None, None]
    v7 = x1[0, 0] + conv
    v9 = jnp.maximum(v7, 0.0)
    v11 = conv + v9
    return jnp.maximum(v11, 0.0).reshape(C_OUT, HW)


if __name__ == "__main__":
    key = jax.random.PRNGKey(0)
    kx, kw, kb = jax.random.split(key, 3)
    x1 = jax.random.normal(kx, (1, 1, 16, 16), dtype=jnp.float32)
    weight = 0.1 * jax.random.normal(kw, (C_OUT, 1, KH, KW), dtype=jnp.float32)
    bias = 0.1 * jax.random.normal(kb, (C_OUT,), dtype=jnp.float32)

    out = jax.block_until_ready(model_forward(x1, weight, bias))
    ref = jax.block_until_ready(reference_forward(x1, weight, bias))

    assert out.shape == (C_OUT, HW), out.shape
    assert out.dtype == jnp.float32
    assert np.allclose(np.asarray(out), np.asarray(ref), atol=1e-5, rtol=1e-5)
    print("KERNEL_OK")
</pallas_src>

<mosaic_0001>
module attributes {stable_mosaic.version = 11 : i64} {
  func.func @conv_fuse_kernel(%arg0: memref<1x256xf32, #tpu.memory_space<vmem>>, %arg1: memref<4x9xf32, #tpu.memory_space<vmem>>, %arg2: memref<4x1xf32, #tpu.memory_space<vmem>>, %arg3: memref<9x256xf32, #tpu.memory_space<vmem>>, %arg4: memref<4x256xf32, #tpu.memory_space<vmem>>) attributes {dimension_semantics = [], scalar_prefetch = 0 : i64, scratch_operands = 0 : i64, tpu.core_type = #tpu.core_type<tc>} {
    %c0 = arith.constant 0 : index
    %c0_0 = arith.constant 0 : index
    %0 = vector.load %arg0[%c0, %c0_0] : memref<1x256xf32, #tpu.memory_space<vmem>>, vector<1x256xf32>
    %c0_1 = arith.constant 0 : index
    %c0_2 = arith.constant 0 : index
    %1 = vector.load %arg1[%c0_1, %c0_2] : memref<4x9xf32, #tpu.memory_space<vmem>>, vector<4x9xf32>
    %c0_3 = arith.constant 0 : index
    %c0_4 = arith.constant 0 : index
    %2 = vector.load %arg3[%c0_3, %c0_4] : memref<9x256xf32, #tpu.memory_space<vmem>>, vector<9x256xf32>
    %c0_5 = arith.constant 0 : index
    %c0_6 = arith.constant 0 : index
    %3 = vector.load %arg2[%c0_5, %c0_6] : memref<4x1xf32, #tpu.memory_space<vmem>>, vector<4x1xf32>
    %4 = vector.shape_cast %3 : vector<4x1xf32> to vector<4x1xf32>
    %5 = vector.broadcast %4 : vector<4x1xf32> to vector<4x256xf32>
    %c17_i32 = arith.constant 17 : i32
    %6 = tpu.dynamic_rotate %0 by %c17_i32 dim 1 : vector<1x256xf32>, i32 -> vector<1x256xf32>
    %7 = vector.extract_strided_slice %2 {offsets = [0, 0], sizes = [1, 256], strides = [1, 1]} : vector<9x256xf32> to vector<1x256xf32>
    %8 = arith.mulf %6, %7 : vector<1x256xf32>
    %9 = vector.extract_strided_slice %1 {offsets = [0, 0], sizes = [4, 1], strides = [1, 1]} : vector<4x9xf32> to vector<4x1xf32>
    %10 = vector.broadcast %9 : vector<4x1xf32> to vector<4x256xf32>
    %11 = vector.broadcast %8 : vector<1x256xf32> to vector<4x256xf32>
    %12 = arith.mulf %10, %11 : vector<4x256xf32>
    %13 = arith.addf %5, %12 : vector<4x256xf32>
    %c16_i32 = arith.constant 16 : i32
    %14 = tpu.dynamic_rotate %0 by %c16_i32 dim 1 : vector<1x256xf32>, i32 -> vector<1x256xf32>
    %15 = vector.extract_strided_slice %2 {offsets = [1, 0], sizes = [1, 256], strides = [1, 1]} : vector<9x256xf32> to vector<1x256xf32>
    %16 = arith.mulf %14, %15 : vector<1x256xf32>
    %17 = vector.extract_strided_slice %1 {offsets = [0, 1], sizes = [4, 1], strides = [1, 1]} : vector<4x9xf32> to vector<4x1xf32>
    %18 = vector.broadcast %17 : vector<4x1xf32> to vector<4x256xf32>
    %19 = vector.broadcast %16 : vector<1x256xf32> to vector<4x256xf32>
    %20 = arith.mulf %18, %19 : vector<4x256xf32>
    %21 = arith.addf %13, %20 : vector<4x256xf32>
    %c15_i32 = arith.constant 15 : i32
    %22 = tpu.dynamic_rotate %0 by %c15_i32 dim 1 : vector<1x256xf32>, i32 -> vector<1x256xf32>
    %23 = vector.extract_strided_slice %2 {offsets = [2, 0], sizes = [1, 256], strides = [1, 1]} : vector<9x256xf32> to vector<1x256xf32>
    %24 = arith.mulf %22, %23 : vector<1x256xf32>
    %25 = vector.extract_strided_slice %1 {offsets = [0, 2], sizes = [4, 1], strides = [1, 1]} : vector<4x9xf32> to vector<4x1xf32>
    %26 = vector.broadcast %25 : vector<4x1xf32> to vector<4x256xf32>
    %27 = vector.broadcast %24 : vector<1x256xf32> to vector<4x256xf32>
    %28 = arith.mulf %26, %27 : vector<4x256xf32>
    %29 = arith.addf %21, %28 : vector<4x256xf32>
    %c1_i32 = arith.constant 1 : i32
    %30 = tpu.dynamic_rotate %0 by %c1_i32 dim 1 : vector<1x256xf32>, i32 -> vector<1x256xf32>
    %31 = vector.extract_strided_slice %2 {offsets = [3, 0], sizes = [1, 256], strides = [1, 1]} : vector<9x256xf32> to vector<1x256xf32>
    %32 = arith.mulf %30, %31 : vector<1x256xf32>
    %33 = vector.extract_strided_slice %1 {offsets = [0, 3], sizes = [4, 1], strides = [1, 1]} : vector<4x9xf32> to vector<4x1xf32>
    %34 = vector.broadcast %33 : vector<4x1xf32> to vector<4x256xf32>
    %35 = vector.broadcast %32 : vector<1x256xf32> to vector<4x256xf32>
    %36 = arith.mulf %34, %35 : vector<4x256xf32>
    %37 = arith.addf %29, %36 : vector<4x256xf32>
    %38 = vector.extract_strided_slice %1 {offsets = [0, 4], sizes = [4, 1], strides = [1, 1]} : vector<4x9xf32> to vector<4x1xf32>
    %39 = vector.broadcast %38 : vector<4x1xf32> to vector<4x256xf32>
    %40 = vector.broadcast %0 : vector<1x256xf32> to vector<4x256xf32>
    %41 = arith.mulf %39, %40 : vector<4x256xf32>
    %42 = arith.addf %37, %41 : vector<4x256xf32>
    %c255_i32 = arith.constant 255 : i32
    %43 = tpu.dynamic_rotate %0 by %c255_i32 dim 1 : vector<1x256xf32>, i32 -> vector<1x256xf32>
    %44 = vector.extract_strided_slice %2 {offsets = [5, 0], sizes = [1, 256], strides = [1, 1]} : vector<9x256xf32> to vector<1x256xf32>
    %45 = arith.mulf %43, %44 : vector<1x256xf32>
    %46 = vector.extract_strided_slice %1 {offsets = [0, 5], sizes = [4, 1], strides = [1, 1]} : vector<4x9xf32> to vector<4x1xf32>
    %47 = vector.broadcast %46 : vector<4x1xf32> to vector<4x256xf32>
    %48 = vector.broadcast %45 : vector<1x256xf32> to vector<4x256xf32>
    %49 = arith.mulf %47, %48 : vector<4x256xf32>
    %50 = arith.addf %42, %49 : vector<4x256xf32>
    %c241_i32 = arith.constant 241 : i32
    %51 = tpu.dynamic_rotate %0 by %c241_i32 dim 1 : vector<1x256xf32>, i32 -> vector<1x256xf32>
    %52 = vector.extract_strided_slice %2 {offsets = [6, 0], sizes = [1, 256], strides = [1, 1]} : vector<9x256xf32> to vector<1x256xf32>
    %53 = arith.mulf %51, %52 : vector<1x256xf32>
    %54 = vector.extract_strided_slice %1 {offsets = [0, 6], sizes = [4, 1], strides = [1, 1]} : vector<4x9xf32> to vector<4x1xf32>
    %55 = vector.broadcast %54 : vector<4x1xf32> to vector<4x256xf32>
    %56 = vector.broadcast %53 : vector<1x256xf32> to vector<4x256xf32>
    %57 = arith.mulf %55, %56 : vector<4x256xf32>
    %58 = arith.addf %50, %57 : vector<4x256xf32>
    %c240_i32 = arith.constant 240 : i32
    %59 = tpu.dynamic_rotate %0 by %c240_i32 dim 1 : vector<1x256xf32>, i32 -> vector<1x256xf32>
    %60 = vector.extract_strided_slice %2 {offsets = [7, 0], sizes = [1, 256], strides = [1, 1]} : vector<9x256xf32> to vector<1x256xf32>
    %61 = arith.mulf %59, %60 : vector<1x256xf32>
    %62 = vector.extract_strided_slice %1 {offsets = [0, 7], sizes = [4, 1], strides = [1, 1]} : vector<4x9xf32> to vector<4x1xf32>
    %63 = vector.broadcast %62 : vector<4x1xf32> to vector<4x256xf32>
    %64 = vector.broadcast %61 : vector<1x256xf32> to vector<4x256xf32>
    %65 = arith.mulf %63, %64 : vector<4x256xf32>
    %66 = arith.addf %58, %65 : vector<4x256xf32>
    %c239_i32 = arith.constant 239 : i32
    %67 = tpu.dynamic_rotate %0 by %c239_i32 dim 1 : vector<1x256xf32>, i32 -> vector<1x256xf32>
    %68 = vector.extract_strided_slice %2 {offsets = [8, 0], sizes = [1, 256], strides = [1, 1]} : vector<9x256xf32> to vector<1x256xf32>
    %69 = arith.mulf %67, %68 : vector<1x256xf32>
    %70 = vector.extract_strided_slice %1 {offsets = [0, 8], sizes = [4, 1], strides = [1, 1]} : vector<4x9xf32> to vector<4x1xf32>
    %71 = vector.broadcast %70 : vector<4x1xf32> to vector<4x256xf32>
    %72 = vector.broadcast %69 : vector<1x256xf32> to vector<4x256xf32>
    %73 = arith.mulf %71, %72 : vector<4x256xf32>
    %74 = arith.addf %66, %73 : vector<4x256xf32>
    %75 = vector.broadcast %0 : vector<1x256xf32> to vector<4x256xf32>
    %76 = arith.addf %75, %74 : vector<4x256xf32>
    %cst = arith.constant 0.000000e+00 : f32
    %77 = vector.broadcast %cst : f32 to vector<4x256xf32>
    %78 = arith.maximumf %76, %77 : vector<4x256xf32>
    %79 = arith.addf %74, %78 : vector<4x256xf32>
    %cst_7 = arith.constant 0.000000e+00 : f32
    %80 = vector.broadcast %cst_7 : f32 to vector<4x256xf32>
    %81 = arith.maximumf %79, %80 : vector<4x256xf32>
    %c0_8 = arith.constant 0 : index
    %c0_9 = arith.constant 0 : index
    %82 = vector.load %arg4[%c0_8, %c0_9] : memref<4x256xf32, #tpu.memory_space<vmem>>, vector<4x256xf32>
    tpu.vector_store %arg4[%c0_8, %c0_9], %81 {strides = array<i32>} : memref<4x256xf32, #tpu.memory_space<vmem>>, vector<4x256xf32>,
    return
  }
}

</mosaic_0001>

<bundles_post_ra>
// kernel: model_forward.1
= control target key start
LH: loop header
LB: loop body
LE: loop exit
PB: predicated region body
PF: predicated region fallthrough
CT: control target
= control target key end

     0   :  { %v309_v2 = vmov 0   ;;  %s444_s0 = inlined_call_operand.vmem [shape: f32[1,256], index: 0, kind: input, shape index: {}]   ;;  %s445_s1 = inlined_call_operand.vmem [shape: f32[4,9], index: 1, kind: input, shape index: {}]   ;;  %s446_s2 = inlined_call_operand.vmem [shape: f32[4,1], index: 2, kind: input, shape index: {}]   ;;  %s447_s3 = inlined_call_operand.vmem [shape: f32[9,256], index: 3, kind: input, shape index: {}]   ;;  %s448_s4 = inlined_call_operand.hbm [shape: f32[4,256], index: 4, kind: output, shape index: {}]  }
   0x1   :  { %v24_v0 = vld [vmem:[%s446_s2] sm:$0xf]  ;;  %273 = vset.pattern.permute.xlu0 %v309_v2  ;;  %274 = vset.pattern.permute.xlu1 %v309_v2 }
   0x2   :  { %v18_v1 = vld [vmem:[%s444_s0] sm:$0x3]  ;;  %27 = vperm.xlu0 %273, %v24_v0  }
   0x3   :  { %v358_v3 = vperm.slane %v18_v1, 1  ;;  %v360_v4 = vperm.slane %v18_v1, 0 }
   0x4   :  { %9 = vsyncpa [#allocation3], 0  ;;  %s310_s19 = smov 17   ;;  %s311_s20 = smov 16   ;;  %v19_v5 = vld [vmem:[%s445_s1] sm:$0xf]  ;;  %v39_v25 = vlaneseq }
   0x5   :  { %37 = vrot.lane.b32.xlu1 %v358_v3, %s310_s19  ;;  %57 = vrot.lane.b32.xlu2 %v360_v4, %s311_s20  ;;  %v312_v6 = vmov 1   ;;  %s313_s0 = smov 15   ;;  %v314_v7 = vmov 2   ;;  %s315_s22 = smov 1   ;;  %v316_v8 = vmov 3   ;;  %v318_v9 = vmov 4  }
   0x6   :  { %s317_s1 = smov 127   ;;  %v319_v10 = vmov 7   ;;  %s320_s23 = smov 112   ;;  %v322_v11 = vmov 8   ;;  %v324_v12 = vmov 5   ;;  %v325_v13 = vmov 6  }
   0x7   :  { %281 = vset.pattern.permute.xlu2 %v319_v10  ;;  %s321_s24 = smov 113   ;;  %s323_s25 = smov 111   ;;  %v381_v27 = vand.u32 127, %v39_v25  ;;  %v387_v31 = vld [vmem:[%s447_s3] sm:$0xff]  ;;  %v395_v34 = vld [vmem:[%s447_s3 + $0x8] sm:$0xff]  ;;  %vm235_vm8 = vcmask 1043456  }
   0x8   :  { %v66_v36 = vrot.slane %v387_v31, 1  ;;  %v67_v41 = vrot.slane %v395_v34, 1  ;;  %v89_v46 = vrot.slane %v387_v31, 2  ;;  %v90_v47 = vrot.slane %v395_v34, 2  ;;  %s246_s11 = sshll.u32 %s448_s4, 4  ;;  %s247_s11 = int_to_ptr.hbm [resolvable:$true] %s246_s11 }
   0x9   :  { %vm41_vm0 = vcmp.lt.s32.totalorder %v381_v27, 17  ;;  %vm61_vm1 = vcmp.lt.s32.totalorder %v381_v27, 16  ;;  %vm86_vm2 = vcmp.lt.s32.totalorder %v381_v27, 15  ;;  %vm109_vm3 = vcmp.lt.s32.totalorder %v381_v27, 1 }
   0xa   :  { %35 = vrot.lane.b32.xlu0 %v360_v4, %s310_s19  ;;  %v112_v55 = vrot.slane %v387_v31, 3  ;;  %v113_v56 = vrot.slane %v395_v34, 3  ;;  %vm140_vm4 = vcmp.lt.s32.totalorder %v381_v27, 127  ;;  %v143_v10 = vrot.slane %v387_v31, 5 }
   0xb   :  { %275 = vset.pattern.permute.xlu0 %v312_v6  ;;  %vm163_vm5 = vcmp.lt.s32.totalorder %v381_v27, 113  ;;  %vm186_vm6 = vcmp.lt.s32.totalorder %v381_v27, 112  ;;  %v190_v25 = vrot.slane %v395_v34, 7  ;;  %vm209_vm7 = vcmp.lt.s32.totalorder %v381_v27, 111 }
   0xd   :  { %48 = vperm.xlu1 %274, %v19_v5   ;;  %59 = vrot.lane.b32.xlu2 %v358_v3, %s311_s20 }
  0x12   :  { %73 = vperm.xlu0 %275, %v19_v5  }
  0x15   :  { %82 = vrot.lane.b32.xlu1 %v360_v4, %s313_s0  ;;  %84 = vrot.lane.b32.xlu2 %v358_v3, %s313_s0 }
  0x16   :  { %276 = vset.pattern.permute.xlu1 %v314_v7 }
  0x1a   :  { %107 = vrot.lane.b32.xlu0 %v358_v3, %s315_s22 }
  0x1b   :  { %277 = vset.pattern.permute.xlu0 %v316_v8 }
  0x1d   :  { %96 = vperm.xlu1 %276, %v19_v5   ;;  %105 = vrot.lane.b32.xlu2 %v360_v4, %s315_s22 }
  0x22   :  { %119 = vperm.xlu0 %277, %v19_v5  }
  0x25   :  { %136 = vrot.lane.b32.xlu1 %v360_v4, %s317_s1  ;;  %138 = vrot.lane.b32.xlu2 %v358_v3, %s317_s1 }
  0x26   :  { %278 = vset.pattern.permute.xlu1 %v318_v9 }
  0x2a   :  { %184 = vrot.lane.b32.xlu0 %v358_v3, %s320_s23 }
  0x2b   :  { %282 = vset.pattern.permute.xlu0 %v322_v11  ;;  %v144_v11 = vrot.slane %v395_v34, 5 }
  0x2d   :  { %159 = vrot.lane.b32.xlu1 %v360_v4, %s321_s24  ;;  %161 = vrot.lane.b32.xlu2 %v358_v3, %s321_s24 }
  0x32   :  { %207 = vrot.lane.b32.xlu0 %v358_v3, %s323_s25 }
  0x35   :  { %129 = vperm.xlu1 %278, %v19_v5   ;;  %182 = vrot.lane.b32.xlu2 %v360_v4, %s320_s23 }
  0x3a   :  { %215 = vperm.xlu0 %282, %v19_v5  }
  0x3d   :  { %279 = vset.pattern.permute.xlu1 %v324_v12  ;;  %205 = vrot.lane.b32.xlu2 %v360_v4, %s323_s25 }
  0x3e   :  { %150 = vperm.xlu1 %279, %v19_v5  }
  0x45   :  { %196 = vperm.xlu2 %281, %v19_v5  }
  0x46   :  { %280 = vset.pattern.permute.xlu1 %v325_v13 }
  0x47   :  { %173 = vperm.xlu1 %280, %v19_v5  }
  0x5f   :  { %v58_v14 = vpop.permute.xlu2 %57 }
  0x67   :  { %v60_v15 = vpop.permute.xlu2 %59 }
  0x68   :  { %v63_v38 = vsel %vm61_vm1, %v60_v15, %v58_v14  ;;  %v62_v42 = vsel %vm61_vm1, %v58_v14, %v60_v15 }
  0x69   :  { %v70_v44 = vmul.f32 %v66_v36, %v63_v38  ;;  %v71_v48 = vmul.f32 %v67_v41, %v62_v42  ;;  %v23_v42 = vld [vmem:[%s447_s3 + $0x18] sm:$0x1] }
  0x6b   :  { %v76_v53 = vperm.slane %v70_v44, 0  ;;  %v77_v63 = vperm.slane %v71_v48, 0 }
  0x6f   :  { %v85_v18 = vpop.permute.xlu2 %84 }
  0x74   :  { %v28_v16 = vpop.permute.xlu0 %27 }
  0x77   :  { %v38_v17 = vpop.permute.xlu1 %37  ;;  %v106_v22 = vpop.permute.xlu2 %105 }
  0x7c   :  { %v36_v20 = vpop.permute.xlu0 %35 }
  0x7d   :  { %v43_v30 = vsel %vm41_vm0, %v38_v17, %v36_v20  ;;  %v42_v32 = vsel %vm41_vm0, %v36_v20, %v38_v17  ;;  %v189_v20 = vrot.slane %v387_v31, 7 }
  0x7e   :  { %v44_v35 = vmul.f32 %v43_v30, %v387_v31  ;;  %v45_v37 = vmul.f32 %v42_v32, %v395_v34 }
  0x7f   :  { %v49_v19 = vpop.permute.xlu1 %48  ;;  %v139_v26 = vpop.permute.xlu2 %138 }
  0x80   :  { %v51_v43 = vperm.slane %v44_v35, 0  ;;  %v52_v45 = vperm.slane %v45_v37, 0 }
  0x82   :  { %v53_v51 = vmul.f32 %v51_v43, %v49_v19  ;;  %v54_v54 = vmul.f32 %v52_v45, %v49_v19 }
  0x84   :  { %v74_v23 = vpop.permute.xlu0 %73  ;;  %v55_v0 = vadd.f32 %v53_v51, %v28_v16  ;;  %v56_v2 = vadd.f32 %v54_v54, %v28_v16 }
  0x85   :  { %v78_v1 = vmul.f32 %v76_v53, %v74_v23  ;;  %v79_v5 = vmul.f32 %v77_v63, %v74_v23 }
  0x87   :  { %v83_v21 = vpop.permute.xlu1 %82  ;;  %v389_v33 = vpop.permute.xlu2 %161  ;;  %v80_v14 = vadd.f32 %v78_v1, %v55_v0 }
  0x88   :  { %v87_v49 = vsel %vm86_vm2, %v83_v21, %v85_v18  ;;  %v88_v50 = vsel %vm86_vm2, %v85_v18, %v83_v21  ;;  %v81_v18 = vadd.f32 %v79_v5, %v56_v2 }
  0x89   :  { %v93_v57 = vmul.f32 %v89_v46, %v88_v50  ;;  %v94_v58 = vmul.f32 %v90_v47, %v87_v49 }
  0x8b   :  { %v99_v8 = vperm.slane %v93_v57, 0  ;;  %v100_v9 = vperm.slane %v94_v58, 0 }
  0x8c   :  { %v108_v28 = vpop.permute.xlu0 %107 }
  0x8d   :  { %v110_v59 = vsel %vm109_vm3, %v106_v22, %v108_v28  ;;  %v111_v60 = vsel %vm109_vm3, %v108_v28, %v106_v22  ;;  %v167_v28 = vrot.slane %v395_v34, 6  ;;  %v22_v34 = vld [vmem:[%s447_s3 + $0x10] sm:$0x1]  ;;  %s326_s3 = smov [#allocation2]  }
  0x8e   :  { %v116_v6 = vmul.f32 %v112_v55, %v111_v60  ;;  %v117_v7 = vmul.f32 %v113_v56, %v110_v59  ;;  %s244_s8 = sshll.u32 %s326_s3, 4  ;;  %s245_s8 = int_to_ptr.vmem [resolvable:$true] %s244_s8 }
  0x8f   :  { %v97_v24 = vpop.permute.xlu1 %96  ;;  %v183_v52 = vpop.permute.xlu2 %182 }
  0x90   :  { %v101_v15 = vmul.f32 %v99_v8, %v97_v24  ;;  %v102_v17 = vmul.f32 %v100_v9, %v97_v24  ;;  %v122_v16 = vperm.slane %v116_v6, 0  ;;  %v123_v19 = vperm.slane %v117_v7, 0 }
  0x92   :  { %v103_v32 = vadd.f32 %v101_v15, %v80_v14  ;;  %v104_v35 = vadd.f32 %v102_v17, %v81_v18 }
  0x94   :  { %v400_v39 = vpop.permute.xlu0 %119 }
  0x95   :  { %v124_v41 = vmul.f32 %v122_v16, %v400_v39 }
  0x97   :  { %v137_v29 = vpop.permute.xlu1 %136  ;;  %v206_v23 = vpop.permute.xlu2 %205 }
  0x98   :  { %v141_v12 = vsel %vm140_vm4, %v137_v29, %v139_v26  ;;  %v142_v13 = vsel %vm140_vm4, %v139_v26, %v137_v29  ;;  %v166_v26 = vrot.slane %v387_v31, 6  ;;  %v125_v31 = vmul.f32 %v123_v19, %v400_v39 }
  0x99   :  { %v147_v21 = vmul.f32 %v143_v10, %v141_v12  ;;  %v148_v22 = vmul.f32 %v144_v11, %v142_v13 }
  0x9a   :  { %v127_v53 = vadd.f32 %v125_v31, %v104_v35 }
  0x9c   :  { %v185_v62 = vpop.permute.xlu0 %184 }
  0x9d   :  { %v187_v29 = vsel %vm186_vm6, %v183_v52, %v185_v62  ;;  %v188_v24 = vsel %vm186_vm6, %v185_v62, %v183_v52  ;;  %v126_v52 = vadd.f32 %v124_v41, %v103_v32 }
  0x9e   :  { %v193_v45 = vmul.f32 %v189_v20, %v187_v29  ;;  %v194_v46 = vmul.f32 %v190_v25, %v188_v24 }
  0x9f   :  { %v160_v40 = vpop.permute.xlu1 %159  ;;  %v197_v62 = vpop.permute.xlu2 %196 }
  0xa0   :  { %v164_v36 = vsel %vm163_vm5, %v160_v40, %v389_v33  ;;  %v165_v37 = vsel %vm163_vm5, %v389_v33, %v160_v40  ;;  %v153_v33 = vperm.slane %v147_v21, 0  ;;  %v154_v40 = vperm.slane %v148_v22, 0 }
  0xa1   :  { %v170_v47 = vmul.f32 %v166_v26, %v164_v36  ;;  %v171_v39 = vmul.f32 %v167_v28, %v165_v37  ;;  %v199_v56 = vperm.slane %v193_v45, 0  ;;  %v200_v57 = vperm.slane %v194_v46, 0 }
  0xa3   :  { %v176_v59 = vperm.slane %v170_v47, 0  ;;  %v177_v60 = vperm.slane %v171_v39, 0  ;;  %v201_v8 = vmul.f32 %v199_v56, %v197_v62  ;;  %v202_v9 = vmul.f32 %v200_v57, %v197_v62 }
  0xa4   :  { %v208_v38 = vpop.permute.xlu0 %207 }
  0xa5   :  { %v210_v43 = vsel %vm209_vm7, %v206_v23, %v208_v38  ;;  %v211_v44 = vsel %vm209_vm7, %v208_v38, %v206_v23 }
  0xa6   :  { %v212_v50 = vmul.f32 %v210_v43, %v22_v34  ;;  %v213_v51 = vmul.f32 %v211_v44, %v23_v42 }
  0xa7   :  { %v130_v61 = vpop.permute.xlu1 %129 }
  0xa8   :  { %v132_v48 = vmul.f32 %v130_v61, %v360_v4  ;;  %v133_v49 = vmul.f32 %v130_v61, %v358_v3  ;;  %v218_v63 = vperm.slane %v212_v50, 0  ;;  %v219_v0 = vperm.slane %v213_v51, 0 }
  0xaa   :  { %v134_v27 = vadd.f32 %v132_v48, %v126_v52  ;;  %v135_v58 = vadd.f32 %v133_v49, %v127_v53 }
  0xac   :  { %v216_v7 = vpop.permute.xlu0 %215 }
  0xad   :  { %v220_v12 = vmul.f32 %v218_v63, %v216_v7  ;;  %v221_v13 = vmul.f32 %v219_v0, %v216_v7 }
  0xb0   :  { %v151_v30 = vpop.permute.xlu1 %150 }
  0xb1   :  { %v155_v54 = vmul.f32 %v153_v33, %v151_v30  ;;  %v156_v55 = vmul.f32 %v154_v40, %v151_v30 }
  0xb3   :  { %v157_v2 = vadd.f32 %v155_v54, %v134_v27  ;;  %v158_v5 = vadd.f32 %v156_v55, %v135_v58 }
  0xb9   :  { %v174_v1 = vpop.permute.xlu1 %173 }
  0xba   :  { %v178_v6 = vmul.f32 %v176_v59, %v174_v1  ;;  %v179_v61 = vmul.f32 %v177_v60, %v174_v1 }
  0xbc   :  { %v180_v10 = vadd.f32 %v178_v6, %v157_v2  ;;  %v181_v11 = vadd.f32 %v179_v61, %v158_v5 }
  0xbe   :  { %v203_v14 = vadd.f32 %v201_v8, %v180_v10  ;;  %v204_v15 = vadd.f32 %v202_v9, %v181_v11 }
  0xc0   :  { %v222_v17 = vadd.f32 %v220_v12, %v203_v14  ;;  %v223_v18 = vadd.f32 %v221_v13, %v204_v15 }
  0xc2   :  { %v224_v16 = vadd.f32 %v222_v17, %v360_v4  ;;  %v225_v19 = vadd.f32 %v223_v18, %v358_v3 }
  0xc4   :  { %v226_v20 = vmax.f32 %v224_v16, 0.0  ;;  %v227_v21 = vmax.f32 %v225_v19, 0.0 }
  0xc6   :  { %v228_v22 = vadd.f32 %v226_v20, %v222_v17  ;;  %v229_v23 = vadd.f32 %v227_v21, %v223_v18 }
  0xc8   :  { %v231_v25 = vmax.f32 %v229_v23, 0.0  ;;  %v230_v26 = vmax.f32 %v228_v22, 0.0 }
  0xca   :  { %v234_v28 = vrot.slane %v231_v25, 4 }
  0xcc   :  { %v236_v29 = vsel %vm235_vm8, %v230_v26, %v234_v28 }
  0xcd   :  { %238 = vst [vmem:[#allocation2] sm:$0xff] %v236_v29 }
  0xce   :  { %249 = dma.vmem_to_hbm [thread:$0]  %s245_s8, 128, %s247_s11, [#allocation3]  }
  0xcf   :  { %307 = dma.done.wait [#allocation3], 128  }
  0xd0   :  { %308 = vsyncadd [#allocation3], 4294967168 }
  0xd1   :  { %254 = vsyncpa [#allocation3], 1 }

</bundles_post_ra>
